<compile_context>
chip_gen: v7x
topology: tpu7x:2x2x1
jax: 0.10.0
libtpu: 0.0.40
codegen_flags: <defaults>
</compile_context>

<pallas_src>
import functools
import numpy as np
import jax
import jax.numpy as jnp
from jax.experimental import pallas as pl
from jax.experimental.pallas import tpu as pltpu

# Small deterministic config consistent with the module (depth reduced for the demo).
B = 2
T = 16                   # power of two (folded-batch local-time index uses a bitmask)
INPUT_DIMS = 4
HIDDEN = 32
OUTPUT = 32              # == HIDDEN so every ConvBlock shares weight shapes
DEPTH = 4                # dilations 1, 2, 4, 8
BT = B * T
CPAD = 128               # channel dims zero-padded to a full lane width

assert T & (T - 1) == 0, "T must be a power of two for the folded-batch time mask"


def _erf_approx(x):
    # Abramowitz & Stegun 7.1.26, |err| < 1.5e-7.  (Matches PyTorch exact-erf GELU
    # well within the 1e-4 test tolerance.)
    a1, a2, a3, a4, a5 = 0.254829592, -0.284496736, 1.421413741, -1.453152027, 1.061405429
    p = 0.3275911
    sgn = jnp.where(x >= 0.0, 1.0, -1.0)
    ax = jnp.abs(x)
    t = 1.0 / (1.0 + p * ax)
    poly = ((((a5 * t + a4) * t + a3) * t + a2) * t + a1) * t
    return sgn * (1.0 - poly * jnp.exp(-ax * ax))


def _gelu_exact(x):
    # PyTorch F.gelu default = exact (erf) gelu; gelu(0) == 0 exactly (keeps padded lanes zero).
    return 0.5 * x * (1.0 + _erf_approx(x * np.float32(1.0 / np.sqrt(2.0))))


def _conv_offsets(i):
    d = 2 ** i
    pad = (d + 1) // 2            # SamePadConv padding = receptive_field // 2
    return (-pad, d - pad)        # tap-0 / tap-1 source time offsets


@functools.cache
def _roll_matches_np_roll():
    """One-time probe of pltpu.roll's rotation direction (np.roll convention expected)."""
    def probe(x_ref, o_ref):
        o_ref[...] = pltpu.roll(x_ref[...], shift=1, axis=0)
    x = jnp.tile(jnp.arange(8, dtype=jnp.float32)[:, None], (1, 128))
    out = pl.pallas_call(probe, out_shape=jax.ShapeDtypeStruct((8, 128), jnp.float32))(x)
    return bool(float(out[0, 0]) == 7.0)     # np.roll(x, 1)[0] == x[7]


def ts_encoder_kernel(use_mask, roll_fwd, x_ref, fcw_ref, fcb_ref, cw_ref, cb_ref,
                      pw_ref, pb_ref, o_ref):
    x = x_ref[...]                                              # (BT, INPUT_DIMS)

    # nan_mask = ~x.isnan().any(-1);  x[~nan_mask] = 0
    nan_f = jnp.isnan(x).astype(jnp.float32)
    row_has_nan = jnp.max(nan_f, axis=-1, keepdims=True) > 0.0  # (BT, 1)
    x = jnp.where(row_has_nan, 0.0, x)

    # Local time index within each folded batch segment (T is a power of two).
    local_t = jnp.bitwise_and(
        jax.lax.broadcasted_iota(jnp.int32, (BT, CPAD), 0), T - 1)

    # input_fc (Linear); padded lanes stay exactly zero (zero weight cols / bias).
    h = jnp.dot(x, fcw_ref[...], preferred_element_type=jnp.float32) + fcb_ref[...]   # (BT, CPAD)

    if use_mask:
        # mask = all-True, mask[:, -1] = False, mask &= nan_mask  (applied post-FC)
        keep = jnp.logical_and(local_t < (T - 1), jnp.logical_not(row_has_nan))
        h = jnp.where(keep, h, 0.0)

    # Hoisted, loop-invariant validity masks: out[t] = z[t+off] is valid iff 0 <= t+off < T.
    offsets = sorted({off for i in range(DEPTH) for off in _conv_offsets(i)} - {0})
    keep_mask = {off: jnp.logical_and(local_t + off >= 0, local_t + off < T)
                 for off in offsets}

    def shifted(z, off):
        """out[b*T + t] = z[b*T + t + off] if 0 <= t+off < T else 0 ('same' zero padding)."""
        if off == 0:
            return z                                            # identity tap: no roll, no mask
        shift = (-off if roll_fwd else off) % BT
        zs = pltpu.roll(z, shift=shift, axis=0)                 # XLU sublane rotation
        return jnp.where(keep_mask[off], zs, 0.0)               # also guards folded-batch edges

    def same_pad_conv(z, i, j):
        off0, off1 = _conv_offsets(i)
        x01 = jnp.concatenate([shifted(z, off0), shifted(z, off1)], axis=-1)   # (BT, 2*CPAD)
        w01 = cw_ref[i * 2 + j]                                 # (2*CPAD, CPAD), taps stacked on K
        b = cb_ref[i * 2 + j]                                   # (1, CPAD)
        return jnp.dot(x01, w01, preferred_element_type=jnp.float32) + b

    # DilatedConvEncoder: per block, gelu -> SamePadConv -> gelu -> SamePadConv -> + residual;
    # the final block applies the 1x1 projector to the residual.
    for i in range(DEPTH):
        if i == DEPTH - 1:
            residual = jnp.dot(h, pw_ref[...], preferred_element_type=jnp.float32) + pb_ref[...]
        else:
            residual = h
        z = _gelu_exact(h)
        z = same_pad_conv(z, i, 0)
        z = _gelu_exact(z)
        z = same_pad_conv(z, i, 1)
        h = z + residual

    # TODO(synk): repr_dropout (p=0.1) treated as identity (eval mode).
    o_ref[...] = h.astype(o_ref.dtype)                          # lane-dense (BT, 128) store


def _pad_lanes(a, axes):
    pads = [(0, 0)] * a.ndim
    for ax in axes:
        pads[ax] = (0, CPAD - a.shape[ax])
    return jnp.pad(a, pads)


def prepare_params(params):
    """One-time: zero-pad every channel axis to CPAD lanes; stack the two conv taps along K."""
    fcw, fcb, cw, cb, pw, pb = params
    fcw_p = _pad_lanes(fcw, [1])                                 # (INPUT_DIMS, CPAD)
    fcb_p = _pad_lanes(fcb, [1])                                 # (1, CPAD)
    cw_p = _pad_lanes(cw, [3, 4])                                # (DEPTH, 2, 2, CPAD, CPAD)
    cw_stacked = cw_p.reshape(DEPTH * 2, 2 * CPAD, CPAD)         # [conv, tap-stacked K, C_out]
    cb_p = _pad_lanes(cb, [3]).reshape(DEPTH * 2, 1, CPAD)
    pw_p = _pad_lanes(pw, [0, 1])                                # (CPAD, CPAD)
    pb_p = _pad_lanes(pb, [1])                                   # (1, CPAD)
    return fcw_p, fcb_p, cw_stacked, cb_p, pw_p, pb_p


@functools.cache
def _build_forward(use_mask: bool):
    roll_fwd = _roll_matches_np_roll()                           # resolved outside the jit trace
    kernel = functools.partial(ts_encoder_kernel, use_mask, roll_fwd)
    # Single program, everything resident in VMEM (<2 MiB total); no grid needed.
    call = pl.pallas_call(
        kernel,
        out_shape=jax.ShapeDtypeStruct((BT, CPAD), jnp.float32),
    )

    @jax.jit
    def forward(x, packed):
        fcw_p, fcb_p, cw_stacked, cb_p, pw_p, pb_p = packed
        out = call(x.reshape(BT, INPUT_DIMS), fcw_p, fcb_p, cw_stacked, cb_p, pw_p, pb_p)
        return out[:, :OUTPUT].reshape(B, T, OUTPUT)

    return forward


def ts_encoder_forward(x, packed_params, use_mask=False):
    return _build_forward(bool(use_mask))(x, packed_params)


# ----------------------------- pure-JAX reference -----------------------------
def ref_forward(x, params, use_mask=False):
    fcw, fcb, cw, cb, pw, pb = params
    nan_row = jnp.any(jnp.isnan(x), axis=-1, keepdims=True)      # (B, T, 1)
    x = jnp.where(nan_row, 0.0, x)
    h = jnp.einsum('btd,dh->bth', x, fcw) + fcb[0]
    if use_mask:
        t_idx = jnp.arange(T)[None, :, None]
        keep = (t_idx < T - 1) & jnp.logical_not(nan_row)
        h = jnp.where(keep, h, 0.0)

    def conv1d(z, w0, w1, b, d):
        pad = (d + 1) // 2
        zp = jnp.pad(z, ((0, 0), (pad, pad), (0, 0)))
        out_len = T + 2 * pad - d
        y = (jnp.einsum('btc,cd->btd', zp[:, :out_len], w0)
             + jnp.einsum('btc,cd->btd', zp[:, d:d + out_len], w1) + b)
        if d % 2 == 1:                      # receptive field even -> drop last
            y = y[:, :-1]
        return y

    for i in range(DEPTH):
        d = 2 ** i
        final = (i == DEPTH - 1)
        residual = jnp.einsum('bth,ho->bto', h, pw) + pb[0] if final else h
        z = jax.nn.gelu(h, approximate=False)
        z = conv1d(z, cw[i, 0, 0], cw[i, 0, 1], cb[i, 0, 0], d)
        z = jax.nn.gelu(z, approximate=False)
        z = conv1d(z, cw[i, 1, 0], cw[i, 1, 1], cb[i, 1, 0], d)
        h = z + residual
    return h


def init_params(key):
    ks = jax.random.split(key, 6)
    s = 0.1
    fcw = s * jax.random.normal(ks[0], (INPUT_DIMS, HIDDEN), jnp.float32)
    fcb = s * jax.random.normal(ks[1], (1, HIDDEN), jnp.float32)
    # conv weights: (block, conv{1,2}, tap, C_in, C_out)  (PyTorch Conv1d weight transposed per tap)
    cw = s * jax.random.normal(ks[2], (DEPTH, 2, 2, HIDDEN, HIDDEN), jnp.float32)
    cb = s * jax.random.normal(ks[3], (DEPTH, 2, 1, HIDDEN), jnp.float32)
    pw = s * jax.random.normal(ks[4], (HIDDEN, OUTPUT), jnp.float32)   # final-block projector
    pb = s * jax.random.normal(ks[5], (1, OUTPUT), jnp.float32)
    return fcw, fcb, cw, cb, pw, pb


if __name__ == "__main__":
    key = jax.random.PRNGKey(0)
    kx, kp = jax.random.split(key)
    x = jax.random.normal(kx, (B, T, INPUT_DIMS), jnp.float32)
    x = x.at[0, 3, 1].set(jnp.nan)           # exercise the NaN-row zeroing path
    params = init_params(kp)
    packed = jax.tree_util.tree_map(jax.block_until_ready, prepare_params(params))

    for use_mask in (False, True):           # mask=None path and mask-provided path
        out = jax.block_until_ready(ts_encoder_forward(x, packed, use_mask=use_mask))
        ref = ref_forward(x, params, use_mask=use_mask)
        np.testing.assert_allclose(np.asarray(out), np.asarray(ref), rtol=1e-4, atol=1e-4)

    print("KERNEL_OK")
</pallas_src>

<mosaic_0001>
module attributes {stable_mosaic.version = 11 : i64} {
  func.func @probe(%arg0: memref<8x128xf32, #tpu.memory_space<vmem>>, %arg1: memref<8x128xf32, #tpu.memory_space<vmem>>) attributes {dimension_semantics = [], scalar_prefetch = 0 : i64, scratch_operands = 0 : i64, tpu.core_type = #tpu.core_type<tc>} {
    %c0 = arith.constant 0 : index
    %c0_0 = arith.constant 0 : index
    %0 = vector.load %arg0[%c0, %c0_0] : memref<8x128xf32, #tpu.memory_space<vmem>>, vector<8x128xf32>
    %c1_i32 = arith.constant 1 : i32
    %1 = tpu.dynamic_rotate %0 by %c1_i32 dim 0 : vector<8x128xf32>, i32 -> vector<8x128xf32>
    %c0_1 = arith.constant 0 : index
    %c0_2 = arith.constant 0 : index
    %2 = vector.load %arg1[%c0_1, %c0_2] : memref<8x128xf32, #tpu.memory_space<vmem>>, vector<8x128xf32>
    tpu.vector_store %arg1[%c0_1, %c0_2], %1 {strides = array<i32>} : memref<8x128xf32, #tpu.memory_space<vmem>>, vector<8x128xf32>,
    return
  }
}

</mosaic_0001>

<bundles_post_ra>
// kernel: tpu_custom_call.1
= control target key start
LH: loop header
LB: loop body
LE: loop exit
PB: predicated region body
PF: predicated region fallthrough
CT: control target
= control target key end

     0   :  { %6 = vsyncpa [#allocation3], 0  ;;  %s125_s0 = inlined_call_operand.hbm [shape: f32[8,128], index: 0, kind: input, shape index: {}]   ;;  %s126_s1 = inlined_call_operand.hbm [shape: f32[8,128], index: 1, kind: output, shape index: {}]  }
   0x1   :  { %7 = vsyncpa [#allocation4], 0  ;;  %s89_s6 = smov [#allocation2]   ;;  %s41_s10 = scalar_lea.hbm %s125_s0, 128 }
   0x2   :  { %s14_s7 = sshll.u32 %s89_s6, 4  ;;  %p42_p0 = scmp.ne.s32.totalorder %s125_s0, %s41_s10  ;;  %s15_s7 = int_to_ptr.vmem [resolvable:$true] %s14_s7 }
   0x3   :  { %p45_p1 = scmp.lt.u32.totalorder %s41_s10, %s125_s0 }
   0x5   :  { %p47_p2 = pnand %p45_p1, %p42_p0 }
   0x7   :  { %50 = shalt.err (!%p47_p2)
}
   0x8   :  { %s51_s15 = scalar_lea.vmem %s15_s7, 128  ;;  %p56_p4 = scmp.lt.s32.totalorder %s15_s7, %s15_s7 }
   0x9   :  { %p52_p3 = scmp.ne.s32.totalorder %s15_s7, %s51_s15  ;;  %p57_p5 = scmp.lt.s32.totalorder %s51_s15, %s51_s15 }
   0xb   :  { %p58_p6 = por %p57_p5, %p56_p4 }
   0xd   :  { %p59_p7 = pnand %p58_p6, %p52_p3 }
   0xf   :  { %62 = shalt.err (!%p59_p7)
}
  0x10   :  { %17 = dma.hbm_to_vmem [thread:$0]  %s125_s0, 128, %s15_s7, [#allocation3]  }
  0x11   :  { %85 = dma.done.wait [#allocation3], 128  }
  0x12   :  { %86 = vsyncadd [#allocation3], 4294967168  ;;  %s90_s18 = smov [#allocation5]   ;;  %v21_v0 = vld [vmem:[#allocation2] sm:$0xff] }
  0x13   :  { %s30_s19 = sshll.u32 %s90_s18, 4  ;;  %v22_v1 = vrot.slane %v21_v0, 7  ;;  %s31_s19 = int_to_ptr.vmem [resolvable:$true] %s30_s19 }
  0x14   :  { %s63_s20 = scalar_lea.vmem %s31_s19, 128  ;;  %p68_p9 = scmp.lt.s32.totalorder %s31_s19, %s31_s19 }
  0x15   :  { %23 = vst [vmem:[#allocation5] sm:$0xff] %v22_v1  ;;  %p64_p8 = scmp.ne.s32.totalorder %s31_s19, %s63_s20  ;;  %p69_p10 = scmp.lt.s32.totalorder %s63_s20, %s63_s20 }
  0x17   :  { %p70_p11 = por %p69_p10, %p68_p9 }
  0x19   :  { %p71_p12 = pnand %p70_p11, %p64_p8 }
  0x1b   :  { %74 = shalt.err (!%p71_p12)
}
  0x1c   :  { %s75_s23 = scalar_lea.hbm %s126_s1, 128 }
  0x1d   :  { %p76_p13 = scmp.ne.s32.totalorder %s126_s1, %s75_s23  ;;  %p79_p0 = scmp.lt.u32.totalorder %s75_s23, %s126_s1 }
  0x1f   :  { %p81_p1 = pnand %p79_p0, %p76_p13 }
  0x21   :  { %84 = shalt.err (!%p81_p1)
}
  0x22   :  { %33 = dma.vmem_to_hbm [thread:$0]  %s31_s19, 128, %s126_s1, [#allocation4]  }
  0x23   :  { %87 = dma.done.wait [#allocation4], 128  }
  0x24   :  { %88 = vsyncadd [#allocation4], 4294967168 }
  0x25   :  { %37 = vsyncpa [#allocation3], 1 }
  0x26   :  { %38 = vsyncpa [#allocation4], 1 }

</bundles_post_ra>
